<compile_context>
chip_gen: v5e
topology: v5e:2x2
jax: 0.10.0
libtpu: 0.0.40
codegen_flags: <defaults>
</compile_context>

<pallas_src>
import functools

import jax
import jax.numpy as jnp
from jax.experimental import pallas as pl
from jax.experimental.pallas import tpu as pltpu


def _round_up(n, m):
    return ((n + m - 1) // m) * m


def _classifier_kernel(x_ref, w1_ref, b1_ref, w2_ref, b2_ref, w3_ref, b3_ref,
                       out_ref):
    # x / weights are bf16; accumulate in f32 on the MXU, do bias+ReLU in f32.
    x = x_ref[...]
    h = jnp.dot(x, w1_ref[...], preferred_element_type=jnp.float32) + b1_ref[...]
    h = jnp.maximum(h, 0.0).astype(jnp.bfloat16)
    h = jnp.dot(h, w2_ref[...], preferred_element_type=jnp.float32) + b2_ref[...]
    h = jnp.maximum(h, 0.0).astype(jnp.bfloat16)
    logits = jnp.dot(h, w3_ref[...], preferred_element_type=jnp.float32) + b3_ref[...]
    out_ref[...] = logits.astype(out_ref.dtype)


@functools.partial(jax.jit, static_argnames=("tile_b",))
def compute_logits(x, params, *, tile_b=256):
    """Pallas-backed equivalent of Classifier.compute_logits.

    x: [B, D] float32
    params: dict with w1 [D,D], b1 [1,D], w2 [D,D], b2 [1,D], w3 [D,L], b3 [1,L]
            (weights stored transposed vs. nn.Linear, i.e. logits = x @ W + b)
    returns logits [B, L] float32
    """
    B, D = x.shape
    L = params["w3"].shape[1]

    # Lane-dense class dimension: pad L to a multiple of 128.
    L_pad = _round_up(L, 128)
    # Batch tile: large, but never bigger than the (8-aligned) padded batch.
    eff_tile = min(tile_b, _round_up(B, 8))
    B_pad = _round_up(B, eff_tile)
    grid = (B_pad // eff_tile,)

    # --- prepare operands (padding + bf16 casts happen in the wrapper, under jit) ---
    x_p = x
    if B_pad != B:
        x_p = jnp.pad(x_p, ((0, B_pad - B), (0, 0)))
    x_p = x_p.astype(jnp.bfloat16)

    w1 = params["w1"].astype(jnp.bfloat16)
    w2 = params["w2"].astype(jnp.bfloat16)
    b1 = params["b1"].astype(jnp.float32)
    b2 = params["b2"].astype(jnp.float32)
    w3 = params["w3"]
    b3 = params["b3"]
    if L_pad != L:
        w3 = jnp.pad(w3, ((0, 0), (0, L_pad - L)))
        b3 = jnp.pad(b3, ((0, 0), (0, L_pad - L)))
    w3 = w3.astype(jnp.bfloat16)
    b3 = b3.astype(jnp.float32)

    full = lambda i: (0, 0)  # weights / biases: same (full) block every step

    flops = 2 * B_pad * D * (D + D + L_pad)
    bytes_accessed = (
        x_p.size * 2                       # x (bf16)
        + (w1.size + w2.size + w3.size) * 2  # weights (bf16)
        + (b1.size + b2.size + b3.size) * 4  # biases (f32)
        + B_pad * L_pad * 4                # logits out (f32)
    )

    out = pl.pallas_call(
        _classifier_kernel,
        out_shape=jax.ShapeDtypeStruct((B_pad, L_pad), jnp.float32),
        grid_spec=pltpu.PrefetchScalarGridSpec(
            num_scalar_prefetch=0,
            grid=grid,
            in_specs=[
                pl.BlockSpec((eff_tile, D), lambda i: (i, 0)),  # x tile
                pl.BlockSpec((D, D), full),                     # w1
                pl.BlockSpec((1, D), full),                     # b1
                pl.BlockSpec((D, D), full),                     # w2
                pl.BlockSpec((1, D), full),                     # b2
                pl.BlockSpec((D, L_pad), full),                 # w3 (lane-padded)
                pl.BlockSpec((1, L_pad), full),                 # b3 (lane-padded)
            ],
            out_specs=pl.BlockSpec((eff_tile, L_pad), lambda i: (i, 0)),
        ),
        compiler_params=pltpu.CompilerParams(
            dimension_semantics=("parallel",),
            vmem_limit_bytes=32 * 1024 * 1024,
        ),
        cost_estimate=pl.CostEstimate(
            flops=flops, transcendentals=0, bytes_accessed=bytes_accessed),
    )(x_p, w1, b1, w2, b2, w3, b3)

    return out[:B, :L]


def classifier_forward(x, params, *, train=False):
    """Mirrors Classifier.forward with train=False: returns (total_loss, logits).

    # TODO(synk): training branch (soft/hard-label cross-entropy + VAT regularization)
    # requires autograd through the model and data-dependent filtering; not a kernel.
    """
    logits = compute_logits(x, params)
    total_loss = jnp.float32(0.0)
    return total_loss, logits


def init_params(key, n_input, label_number):
    """Deterministic init matching nn.Linear shapes (weights stored transposed)."""
    k1, k2, k3, k4, k5, k6 = jax.random.split(key, 6)
    bound1 = 1.0 / jnp.sqrt(n_input)
    return {
        "w1": jax.random.uniform(k1, (n_input, n_input), jnp.float32, -bound1, bound1),
        "b1": jax.random.uniform(k2, (1, n_input), jnp.float32, -bound1, bound1),
        "w2": jax.random.uniform(k3, (n_input, n_input), jnp.float32, -bound1, bound1),
        "b2": jax.random.uniform(k4, (1, n_input), jnp.float32, -bound1, bound1),
        "w3": jax.random.uniform(k5, (n_input, label_number), jnp.float32, -bound1, bound1),
        "b3": jax.random.uniform(k6, (1, label_number), jnp.float32, -bound1, bound1),
    }


def _reference_logits_f32(x, p):
    h = jax.nn.relu(x @ p["w1"] + p["b1"])
    h = jax.nn.relu(h @ p["w2"] + p["b2"])
    return h @ p["w3"] + p["b3"]


if __name__ == "__main__":
    n_input = 128      # feature dim (lane axis)
    label_number = 16  # number of classes (padded to 128 lanes inside the wrapper)
    batch = 10         # deliberately NOT a multiple of the tile -> exercises padding

    key = jax.random.PRNGKey(0)
    kx, kp = jax.random.split(key)
    x = jax.random.normal(kx, (batch, n_input), dtype=jnp.float32)
    params = init_params(kp, n_input, label_number)

    total_loss, logits = classifier_forward(x, params, train=False)
    logits = jax.block_until_ready(logits)

    ref = _reference_logits_f32(x, params)
    assert logits.shape == (batch, label_number), logits.shape
    # bf16 MXU operands with f32 accumulation -> loose tolerance vs f32 reference.
    assert jnp.allclose(logits, ref, atol=5e-2, rtol=5e-2), "mismatch vs reference"
    assert bool(jnp.all(jnp.isfinite(logits)))
    assert float(total_loss) == 0.0

    print("KERNEL_OK")
</pallas_src>

<mosaic_0001>
module attributes {stable_mosaic.version = 11 : i64} {
  func.func @_classifier_kernel(%arg0: i32, %arg1: memref<16x128xbf16, #tpu.memory_space<vmem>>, %arg2: memref<128x128xbf16, #tpu.memory_space<vmem>>, %arg3: memref<1x128xf32, #tpu.memory_space<vmem>>, %arg4: memref<128x128xbf16, #tpu.memory_space<vmem>>, %arg5: memref<1x128xf32, #tpu.memory_space<vmem>>, %arg6: memref<128x128xbf16, #tpu.memory_space<vmem>>, %arg7: memref<1x128xf32, #tpu.memory_space<vmem>>, %arg8: memref<16x128xf32, #tpu.memory_space<vmem>>) attributes {dimension_semantics = [#tpu.dimension_semantics<parallel>], iteration_bounds = array<i64: 1>, scalar_prefetch = 0 : i64, scratch_operands = 0 : i64, tpu.core_type = #tpu.core_type<tc>, window_params = [{transform_indices = @transform_0, window_bounds = array<i64: 16, 128>}, {pipeline_mode = #tpu.pipeline_mode<synchronous>, transform_indices = @transform_1, window_bounds = array<i64: 128, 128>}, {pipeline_mode = #tpu.pipeline_mode<synchronous>, transform_indices = @transform_2, window_bounds = array<i64: 1, 128>}, {pipeline_mode = #tpu.pipeline_mode<synchronous>, transform_indices = @transform_3, window_bounds = array<i64: 128, 128>}, {pipeline_mode = #tpu.pipeline_mode<synchronous>, transform_indices = @transform_4, window_bounds = array<i64: 1, 128>}, {pipeline_mode = #tpu.pipeline_mode<synchronous>, transform_indices = @transform_5, window_bounds = array<i64: 128, 128>}, {pipeline_mode = #tpu.pipeline_mode<synchronous>, transform_indices = @transform_6, window_bounds = array<i64: 1, 128>}, {transform_indices = @transform_7, window_bounds = array<i64: 16, 128>}]} {
    %c0 = arith.constant 0 : index
    %c0_0 = arith.constant 0 : index
    %0 = vector.load %arg1[%c0, %c0_0] : memref<16x128xbf16, #tpu.memory_space<vmem>>, vector<16x128xbf16>
    %c0_1 = arith.constant 0 : index
    %c0_2 = arith.constant 0 : index
    %1 = vector.load %arg2[%c0_1, %c0_2] : memref<128x128xbf16, #tpu.memory_space<vmem>>, vector<128x128xbf16>
    %cst = arith.constant dense<0.000000e+00> : vector<16x128xf32>
    %2 = tpu.matmul %0, %1, %cst {dimension_numbers = #tpu.dot_dimension_numbers<[1], [0], [0], [1], [0, 0, 1, 1], [], []>} : vector<16x128xbf16>, vector<128x128xbf16>, vector<16x128xf32> -> vector<16x128xf32>
    %c0_3 = arith.constant 0 : index
    %c0_4 = arith.constant 0 : index
    %3 = vector.load %arg3[%c0_3, %c0_4] : memref<1x128xf32, #tpu.memory_space<vmem>>, vector<1x128xf32>
    %4 = vector.broadcast %3 : vector<1x128xf32> to vector<16x128xf32>
    %5 = arith.addf %2, %4 : vector<16x128xf32>
    %cst_5 = arith.constant 0.000000e+00 : f32
    %6 = vector.broadcast %cst_5 : f32 to vector<16x128xf32>
    %7 = arith.maximumf %5, %6 : vector<16x128xf32>
    %8 = arith.truncf %7 : vector<16x128xf32> to vector<16x128xbf16>
    %c0_6 = arith.constant 0 : index
    %c0_7 = arith.constant 0 : index
    %9 = vector.load %arg4[%c0_6, %c0_7] : memref<128x128xbf16, #tpu.memory_space<vmem>>, vector<128x128xbf16>
    %cst_8 = arith.constant dense<0.000000e+00> : vector<16x128xf32>
    %10 = tpu.matmul %8, %9, %cst_8 {dimension_numbers = #tpu.dot_dimension_numbers<[1], [0], [0], [1], [0, 0, 1, 1], [], []>} : vector<16x128xbf16>, vector<128x128xbf16>, vector<16x128xf32> -> vector<16x128xf32>
    %c0_9 = arith.constant 0 : index
    %c0_10 = arith.constant 0 : index
    %11 = vector.load %arg5[%c0_9, %c0_10] : memref<1x128xf32, #tpu.memory_space<vmem>>, vector<1x128xf32>
    %12 = vector.broadcast %11 : vector<1x128xf32> to vector<16x128xf32>
    %13 = arith.addf %10, %12 : vector<16x128xf32>
    %cst_11 = arith.constant 0.000000e+00 : f32
    %14 = vector.broadcast %cst_11 : f32 to vector<16x128xf32>
    %15 = arith.maximumf %13, %14 : vector<16x128xf32>
    %16 = arith.truncf %15 : vector<16x128xf32> to vector<16x128xbf16>
    %c0_12 = arith.constant 0 : index
    %c0_13 = arith.constant 0 : index
    %17 = vector.load %arg6[%c0_12, %c0_13] : memref<128x128xbf16, #tpu.memory_space<vmem>>, vector<128x128xbf16>
    %cst_14 = arith.constant dense<0.000000e+00> : vector<16x128xf32>
    %18 = tpu.matmul %16, %17, %cst_14 {dimension_numbers = #tpu.dot_dimension_numbers<[1], [0], [0], [1], [0, 0, 1, 1], [], []>} : vector<16x128xbf16>, vector<128x128xbf16>, vector<16x128xf32> -> vector<16x128xf32>
    %c0_15 = arith.constant 0 : index
    %c0_16 = arith.constant 0 : index
    %19 = vector.load %arg7[%c0_15, %c0_16] : memref<1x128xf32, #tpu.memory_space<vmem>>, vector<1x128xf32>
    %20 = vector.broadcast %19 : vector<1x128xf32> to vector<16x128xf32>
    %21 = arith.addf %18, %20 : vector<16x128xf32>
    %c0_17 = arith.constant 0 : index
    %c0_18 = arith.constant 0 : index
    %22 = vector.load %arg8[%c0_17, %c0_18] : memref<16x128xf32, #tpu.memory_space<vmem>>, vector<16x128xf32>
    tpu.vector_store %arg8[%c0_17, %c0_18], %21 {strides = array<i32>} : memref<16x128xf32, #tpu.memory_space<vmem>>, vector<16x128xf32>,
    return
  }
  func.func @transform_0(%arg0: i32) -> (i32, i32) {
    %c0_i32 = arith.constant 0 : i32
    %c0_i32_0 = arith.constant 0 : i32
    return %arg0, %c0_i32 : i32, i32
  }
  func.func @transform_1(%arg0: i32) -> (i32, i32) {
    %c0_i32 = arith.constant 0 : i32
    %c0_i32_0 = arith.constant 0 : i32
    %c0_i32_1 = arith.constant 0 : i32
    return %c0_i32, %c0_i32_0 : i32, i32
  }
  func.func @transform_2(%arg0: i32) -> (i32, i32) {
    %c0_i32 = arith.constant 0 : i32
    %c0_i32_0 = arith.constant 0 : i32
    %c0_i32_1 = arith.constant 0 : i32
    return %c0_i32, %c0_i32_0 : i32, i32
  }
  func.func @transform_3(%arg0: i32) -> (i32, i32) {
    %c0_i32 = arith.constant 0 : i32
    %c0_i32_0 = arith.constant 0 : i32
    %c0_i32_1 = arith.constant 0 : i32
    return %c0_i32, %c0_i32_0 : i32, i32
  }
  func.func @transform_4(%arg0: i32) -> (i32, i32) {
    %c0_i32 = arith.constant 0 : i32
    %c0_i32_0 = arith.constant 0 : i32
    %c0_i32_1 = arith.constant 0 : i32
    return %c0_i32, %c0_i32_0 : i32, i32
  }
  func.func @transform_5(%arg0: i32) -> (i32, i32) {
    %c0_i32 = arith.constant 0 : i32
    %c0_i32_0 = arith.constant 0 : i32
    %c0_i32_1 = arith.constant 0 : i32
    return %c0_i32, %c0_i32_0 : i32, i32
  }
  func.func @transform_6(%arg0: i32) -> (i32, i32) {
    %c0_i32 = arith.constant 0 : i32
    %c0_i32_0 = arith.constant 0 : i32
    %c0_i32_1 = arith.constant 0 : i32
    return %c0_i32, %c0_i32_0 : i32, i32
  }
  func.func @transform_7(%arg0: i32) -> (i32, i32) {
    %c0_i32 = arith.constant 0 : i32
    %c0_i32_0 = arith.constant 0 : i32
    return %arg0, %c0_i32 : i32, i32
  }
}

</mosaic_0001>

<bundles_post_ra>
// kernel: compute_logits.1
= control target key start
LH: loop header
LB: loop body
LE: loop exit
PB: predicated region body
PF: predicated region fallthrough
CT: control target
= control target key end

     0   :  { %s594_s0 = inlined_call_operand.vmem [shape: bf16[16,128], index: 0, kind: input, shape index: {}]   ;;  %s595_s1 = inlined_call_operand.vmem [shape: bf16[128,128], index: 1, kind: input, shape index: {}]   ;;  %s596_s2 = inlined_call_operand.vmem [shape: f32[1,128], index: 2, kind: input, shape index: {}]   ;;  %s597_s3 = inlined_call_operand.vmem [shape: bf16[128,128], index: 3, kind: input, shape index: {}]   ;;  %s598_s4 = inlined_call_operand.vmem [shape: f32[1,128], index: 4, kind: input, shape index: {}]   ;;  %s599_s5 = inlined_call_operand.vmem [shape: bf16[128,128], index: 5, kind: input, shape index: {}]   ;;  %s600_s6 = inlined_call_operand.vmem [shape: f32[1,128], index: 6, kind: input, shape index: {}]   ;;  %s601_s7 = inlined_call_operand.hbm [shape: f32[16,128], index: 7, kind: output, shape index: {}]  }
   0x1   :  { %v415_v0 = vld [vmem:[%s595_s1 + $0x38] sm:$0xff]  ;;  %v414_v1 = vld [vmem:[%s595_s1 + $0x30] sm:$0xff] }
   0x2   :  { %103 = vmatpush.bf16.msra.mxu0 %v415_v0  ;;  %v423_v2 = vld [vmem:[%s597_s3 + $0x38] sm:$0xff]  ;;  %v422_v3 = vld [vmem:[%s597_s3 + $0x30] sm:$0xff] }
   0x3   :  { %188 = vmatpush.bf16.msra.mxu1 %v423_v2 }
   0x4   :  { %12 = vsyncpa [#allocation3], 0  ;;  %v413_v4 = vld [vmem:[%s595_s1 + $0x28] sm:$0xff]  ;;  %v412_v6 = vld [vmem:[%s595_s1 + $0x20] sm:$0xff]  ;;  %s466_s10 = smov 8  }
   0x5   :  { %v421_v5 = vld [vmem:[%s597_s3 + $0x28] sm:$0xff]  ;;  %v420_v7 = vld [vmem:[%s597_s3 + $0x20] sm:$0xff]  ;;  %v411_v8 = vld [vmem:[%s595_s1 + $0x18] sm:$0xff] }
   0x6   :  { %104 = vmatpush.bf16.msra.mxu0 %v414_v1  ;;  %v410_v9 = vld [vmem:[%s595_s1 + $0x10] sm:$0xff]  ;;  %v409_v10 = vld [vmem:[%s595_s1 + $0x8] sm:$0xff]  ;;  %v408_v11 = vld [vmem:[%s595_s1] sm:$0xff]  ;;  %s465_s1 = smov 128  }
   0x7   :  { %189 = vmatpush.bf16.msra.mxu1 %v422_v3  ;;  %v407_v12 = vld [vmem:[%s594_s0] sm:$0xff]  ;;  %v419_v13 = vld [vmem:[%s597_s3 + $0x18] sm:$0xff]  ;;  %v418_v14 = vld [vmem:[%s597_s3 + $0x10] sm:$0xff] }
   0x8   :  { %v417_v15 = vld [vmem:[%s597_s3 + $0x8] sm:$0xff]  ;;  %v416_v16 = vld [vmem:[%s597_s3] sm:$0xff]  ;;  %v431_v17 = vld [vmem:[%s599_s5 + $0x38] sm:$0xff] }
   0x9   :  { %273 = vmatpush.bf16.msra.mxu2 %v431_v17  ;;  %v430_v18 = vld [vmem:[%s599_s5 + $0x30] sm:$0xff]  ;;  %v429_v19 = vld [vmem:[%s599_s5 + $0x28] sm:$0xff]  ;;  %v428_v20 = vld [vmem:[%s599_s5 + $0x20] sm:$0xff] }
   0xa   :  { %105 = vmatpush.bf16.msra.mxu0 %v413_v4  ;;  %v435_v22 = vld [vmem:[%s596_s2] ss:$0 sm:$0xff]  ;;  %v427_v29 = vld [vmem:[%s599_s5 + $0x18] sm:$0xff]  ;;  %v426_v30 = vld [vmem:[%s599_s5 + $0x10] sm:$0xff] }
   0xb   :  { %190 = vmatpush.bf16.msra.mxu1 %v421_v5  ;;  %v425_v31 = vld [vmem:[%s599_s5 + $0x8] sm:$0xff]  ;;  %v424_v32 = vld [vmem:[%s599_s5] sm:$0xff]  ;;  %s464_s5 = smov [#allocation2]  }
   0xc   :  { %v436_v34 = vld [vmem:[%s598_s4] ss:$0 sm:$0xff]  ;;  %s293_s30 = sshll.u32 %s464_s5, 4  ;;  %s295_s4 = sshll.u32 %s601_s7, 4  ;;  %s294_s30 = int_to_ptr.vmem [resolvable:$true] %s293_s30  ;;  %s296_s4 = int_to_ptr.hbm [resolvable:$true] %s295_s4 }
   0xd   :  { %274 = vmatpush.bf16.msra.mxu2 %v430_v18  ;;  %v437_v41 = vld [vmem:[%s600_s6] ss:$0 sm:$0xff] }
   0xe   :  { %106 = vmatpush.bf16.msra.mxu0 %v412_v6 }
   0xf   :  { %191 = vmatpush.bf16.msra.mxu1 %v420_v7 }
  0x11   :  { %275 = vmatpush.bf16.msra.mxu2 %v429_v19 }
  0x12   :  { %107 = vmatpush.bf16.msra.mxu0 %v411_v8 }
  0x13   :  { %192 = vmatpush.bf16.msra.mxu1 %v419_v13 }
  0x15   :  { %276 = vmatpush.bf16.msra.mxu2 %v428_v20 }
  0x16   :  { %108 = vmatpush.bf16.msra.mxu0 %v410_v9 }
  0x17   :  { %193 = vmatpush.bf16.msra.mxu1 %v418_v14 }
  0x19   :  { %277 = vmatpush.bf16.msra.mxu2 %v427_v29 }
  0x1a   :  { %109 = vmatpush.bf16.msra.mxu0 %v409_v10 }
  0x1b   :  { %194 = vmatpush.bf16.msra.mxu1 %v417_v15 }
  0x1d   :  { %278 = vmatpush.bf16.msra.mxu2 %v426_v30 }
  0x1e   :  { %110 = vmatpush.bf16.msra.mxu0 %v408_v11 }
  0x1f   :  { %195 = vmatpush.bf16.msra.mxu1 %v416_v16 }
  0x21   :  { %111 = vmatmul.bf16.vlgmr.msra.gmra.mxu0 %v407_v12  ;;  %279 = vmatpush.bf16.msra.mxu2 %v425_v31 }
  0x25   :  { %280 = vmatpush.bf16.msra.mxu2 %v424_v32 }
  0x9e   :  { %v112_v21 = vpop.f32.mrf.mxu0 }
  0x9f   :  { %v113_v23 = vadd.f32 %v435_v22, %v112_v21 }
  0xa1   :  { %v117_v26 = vmax.f32 %v113_v23, 0.0 }
  0xa6   :  { %v114_v24 = vpop.f32.mrf.mxu0 }
  0xa7   :  { %v115_v25 = vadd.f32 %v435_v22, %v114_v24 }
  0xa9   :  { %v118_v27 = vmax.f32 %v115_v25, 0.0 }
  0xab   :  { %v119_v28 = vpack.c.bf16 %v118_v27, %v117_v26 }
  0xad   :  { %196 = vmatmul.bf16.vlgmr.msra.gmra.mxu1 %v119_v28 }
 0x12a   :  { %v197_v33 = vpop.f32.mrf.mxu1 }
 0x12b   :  { %v198_v35 = vadd.f32 %v436_v34, %v197_v33 }
 0x12d   :  { %v202_v38 = vmax.f32 %v198_v35, 0.0 }
 0x132   :  { %v199_v36 = vpop.f32.mrf.mxu1 }
 0x133   :  { %v200_v37 = vadd.f32 %v436_v34, %v199_v36 }
 0x135   :  { %v203_v39 = vmax.f32 %v200_v37, 0.0 }
 0x137   :  { %v204_v40 = vpack.c.bf16 %v203_v39, %v202_v38 }
 0x139   :  { %281 = vmatmul.bf16.vlgmr.msra.gmra.mxu2 %v204_v40 }
 0x1bc   :  { %v282_v42 = vpop.f32.mrf.mxu2 }
 0x1bd   :  { %v283_v43 = vadd.f32 %v437_v41, %v282_v42 }
 0x1bf   :  { %287 = vst [vmem:[#allocation2] sm:$0xff] %v283_v43 }
 0x1c4   :  { %v284_v44 = vpop.f32.mrf.mxu2 }
 0x1c5   :  { %v285_v45 = vadd.f32 %v437_v41, %v284_v44 }
 0x1c7   :  { %288 = vst [vmem:[#allocation2 + $0x8] sm:$0xff] %v285_v45 }
 0x1c8   :  { %301 = dma.vmem_to_hbm [thread:$0]  %s294_s30, 256, %s296_s4, [#allocation3], %s465_s1, %s465_s1, %s466_s10  }
 0x1c9   :  { %462 = dma.done.wait [#allocation3], 256  }
 0x1ca   :  { %463 = vsyncadd [#allocation3], 4294967040 }
 0x1cb   :  { %306 = vsyncpa [#allocation3], 1 }

</bundles_post_ra>
